<compile_context>
chip_gen: v5e
topology: v5e:2x2
jax: 0.10.0
libtpu: 0.0.40
codegen_flags: <defaults>
</compile_context>

<pallas_src>
import functools
import math

import jax
import jax.numpy as jnp
from jax.experimental import pallas as pl
from jax.experimental.pallas import tpu as pltpu


def _round_up(x: int, m: int) -> int:
    return ((x + m - 1) // m) * m


# ---------------------------------------------------------------------------
# Kernels
# ---------------------------------------------------------------------------

def _dense_kernel_f32_out(x_ref, w_ref, b_ref, o_ref):
    """f32 output: accumulate directly into the resident output tile."""
    k = pl.program_id(2)

    @pl.when(k == 0)
    def _init():
        # Seed the resident output tile with the f32 bias (added exactly once).
        o_ref[...] = jnp.zeros_like(o_ref) + b_ref[...]

    o_ref[...] += jnp.dot(x_ref[...], w_ref[...],
                          preferred_element_type=jnp.float32)


def _dense_kernel_acc(x_ref, w_ref, b_ref, o_ref, acc_ref):
    """Non-f32 output: f32 VMEM scratch accumulator, cast in the epilogue."""
    k = pl.program_id(2)

    @pl.when(k == 0)
    def _init():
        acc_ref[...] = jnp.zeros_like(acc_ref)

    acc_ref[...] += jnp.dot(x_ref[...], w_ref[...],
                            preferred_element_type=jnp.float32)

    @pl.when(k == pl.num_programs(2) - 1)
    def _finalize():
        # Bias add in f32 on the last K step only.
        o_ref[...] = (acc_ref[...] + b_ref[...]).astype(o_ref.dtype)


# ---------------------------------------------------------------------------
# Chip-aware tile planning
# ---------------------------------------------------------------------------

@functools.lru_cache(maxsize=None)
def _tpu_chip_config():
    kind = ""
    try:
        kind = jax.devices()[0].device_kind.lower()
    except Exception:
        pass
    is_v7 = ("v7" in kind) or ("7x" in kind)
    is_v6 = "v6" in kind
    is_v5e = ("v5e" in kind) or ("v5 lite" in kind) or ("v5lite" in kind)

    vmem_cap = None
    try:
        vmem_cap = int(getattr(pltpu.get_tpu_info(), "vmem_capacity_bytes", 0)) or None
    except Exception:
        vmem_cap = None
    if vmem_cap is None:
        vmem_cap = (64 if is_v7 else 128 if (is_v5e or is_v6) else 64) * 1024 * 1024

    # Per-generation cap on what we let the kernel schedule into VMEM.
    if is_v7:                      # 64 MiB / TensorCore
        budget = min(int(0.85 * vmem_cap), 56 * 1024 * 1024)
    elif is_v5e or is_v6:          # 128 MiB — use it for operand residency
        budget = min(int(0.80 * vmem_cap), 100 * 1024 * 1024)
    else:                          # unknown chip: conservative
        budget = min(int(0.75 * vmem_cap), 100 * 1024 * 1024)
    budget = max(budget, 16 * 1024 * 1024)

    return {
        "budget": budget,
        "mxu_align": 256 if (is_v6 or is_v7) else 128,   # 2x256^2 MXU on v6e/v7x
        "w_buffers": 3 if is_v5e else 2,                 # deeper buffering on v5e
        "two_cores": is_v7,                              # 2 TCs/chip on v7x only
    }


@functools.lru_cache(maxsize=None)
def _plan(M, K, N, in_isz, out_isz, use_scratch):
    cfg = _tpu_chip_config()
    align_n = cfg["mxu_align"] if N >= cfg["mxu_align"] else 128
    align_k = cfg["mxu_align"] if K >= cfg["mxu_align"] else 128

    # Full-M residency for modest batches: the weight matrix then streams from
    # HBM exactly once. Otherwise large 512-row tiles.
    Mp_min = _round_up(M, 8)
    tm = Mp_min if Mp_min <= 1024 else 512
    tn = min(512, _round_up(N, align_n))
    tk = min(1024, _round_up(K, align_k))

    # v7x: make sure a parallel grid axis has >=2 blocks so both TCs get work.
    if cfg["two_cores"] and _round_up(M, tm) // tm <= 1:
        Np0 = _round_up(N, align_n)
        if Np0 >= 2 * align_n:
            tn = min(tn, max(align_n, (Np0 // 2) // align_n * align_n))

    def _need(tm_, tn_, tk_):
        nbytes = 2 * tm_ * tk_ * in_isz                     # x (double-buffered)
        nbytes += cfg["w_buffers"] * tk_ * tn_ * in_isz     # w_t buffers
        nbytes += 2 * tn_ * 4                               # f32 bias
        nbytes += 2 * tm_ * tn_ * out_isz                   # output tile
        if use_scratch:
            nbytes += tm_ * tn_ * 4                         # f32 accumulator
        return nbytes

    # Shrink tiles until the pipelined working set fits the VMEM budget.
    while _need(tm, tn, tk) > cfg["budget"]:
        if tk > align_k:
            tk = max(align_k, _round_up(tk // 2, align_k))
        elif tn > align_n:
            tn = max(align_n, _round_up(tn // 2, align_n))
        elif tm > 8:
            tm = max(8, _round_up(tm // 2, 8))
        else:
            break

    Kp = _round_up(K, tk)
    Np = _round_up(N, tn)
    vmem_limit = max(min(_need(tm, tn, tk) + (4 << 20), cfg["budget"]), 16 << 20)

    return {
        "tm": tm, "tn": tn, "tk": tk, "Kp": Kp, "Np": Np,
        "w_buffers": cfg["w_buffers"], "vmem_limit": int(vmem_limit),
    }


# ---------------------------------------------------------------------------
# Jit'd forward (weight arrives already transposed/cast/padded)
# ---------------------------------------------------------------------------

@functools.partial(
    jax.jit,
    static_argnames=("tm", "tn", "tk", "w_buffers", "vmem_limit", "compute_dtype"),
)
def _dense_forward(x, w_t, b, *, tm, tn, tk, w_buffers, vmem_limit,
                   compute_dtype=None):
    M, K = x.shape
    Kp, Np = w_t.shape
    N = b.shape[1]
    out_dtype = jnp.dtype(x.dtype)
    use_scratch = out_dtype != jnp.dtype(jnp.float32)

    if compute_dtype is not None:
        # Activation cast only; the weight was cast once outside this jit and
        # the bias stays f32 (epilogue add is f32 on the VPU).
        x = x.astype(compute_dtype)
    in_isz = jnp.dtype(x.dtype).itemsize
    out_isz = out_dtype.itemsize

    Mp = _round_up(M, tm)
    if (Mp, Kp) != (M, K):
        # Zero K-padding is exact for the dot product; M/N padding is sliced off.
        # TODO(synk): use CompilerParams(allow_input_fusion=...) or fuse into the
        # producer to avoid this extra HBM pass for very large activations.
        x = jnp.pad(x, ((0, Mp - M), (0, Kp - K)))
    if Np != N:
        b = jnp.pad(b, ((0, 0), (0, Np - N)))

    grid = (Mp // tm, Np // tn, Kp // tk)

    # Deeper buffering on the streamed weight tiles (v5e) when there are enough
    # distinct weight blocks for it to matter.
    w_spec_kwargs = {}
    if w_buffers != 2 and (Kp // tk) * (Np // tn) >= w_buffers:
        w_spec_kwargs["pipeline_mode"] = pl.Buffered(w_buffers)

    in_specs = [
        pl.BlockSpec((tm, tk), lambda i, j, k: (i, k)),                  # x
        pl.BlockSpec((tk, tn), lambda i, j, k: (k, j), **w_spec_kwargs), # w_t
        pl.BlockSpec((1, tn), lambda i, j, k: (0, j)),                   # bias (f32)
    ]
    out_spec = pl.BlockSpec((tm, tn), lambda i, j, k: (i, j))

    if use_scratch:
        kernel = _dense_kernel_acc
        scratch_shapes = [pltpu.VMEM((tm, tn), jnp.float32)]
    else:
        kernel = _dense_kernel_f32_out
        scratch_shapes = []

    cost = pl.CostEstimate(
        flops=2 * Mp * Np * Kp,
        transcendentals=0,
        # Tiled re-streaming: x is read once per N-block, w_t once per M-block.
        bytes_accessed=(Mp * Kp * (Np // tn) + Kp * Np * (Mp // tm)) * in_isz
                       + Np * 4 + Mp * Np * out_isz,
    )

    out = pl.pallas_call(
        kernel,
        out_shape=jax.ShapeDtypeStruct((Mp, Np), out_dtype),
        grid_spec=pltpu.PrefetchScalarGridSpec(
            num_scalar_prefetch=0,
            grid=grid,
            in_specs=in_specs,
            out_specs=out_spec,
            scratch_shapes=scratch_shapes,
        ),
        compiler_params=pltpu.CompilerParams(
            dimension_semantics=("parallel", "parallel", "arbitrary"),
            vmem_limit_bytes=int(vmem_limit),
        ),
        cost_estimate=cost,
    )(x, w_t, b)

    if (Mp, Np) != (M, N):
        out = out[:M, :N]
    return out


# ---------------------------------------------------------------------------
# DenseLayer equivalent
# ---------------------------------------------------------------------------

class DenseLayerPallas:
    """Pallas-TPU equivalent of DenseLayer (nn.Linear): y = x @ W.T + b."""

    def __init__(self, weight, bias, *, compute_dtype=None):
        # weight: (output_dim, input_dim) — PyTorch nn.Linear layout.
        # compute_dtype=jnp.bfloat16 uses the native MXU width on v6e/v7x while
        # keeping f32 accumulation + f32 bias add.
        # TODO(synk): optional v7x fp8 weight path (pre-quantized weights with
        # scales applied in the f32 epilogue).
        self.output_dim, self.input_dim = weight.shape
        self.compute_dtype = compute_dtype
        self._weight = jnp.asarray(weight)
        self._bias = jnp.asarray(bias, jnp.float32).reshape(1, self.output_dim)
        self._prepared = {}  # (Kp, Np) -> transposed/cast/padded weight

    def _prepare_weight(self, plan):
        key = (plan["Kp"], plan["Np"])
        if key not in self._prepared:
            # Parameter prep happens ONCE, outside the jit'd hot path: no
            # per-step cast/pad HBM passes over the weight matrix.
            w_t = jnp.transpose(self._weight)                  # (K, N)
            if self.compute_dtype is not None:
                w_t = w_t.astype(self.compute_dtype)
            Kp, Np = key
            if (Kp, Np) != (self.input_dim, self.output_dim):
                w_t = jnp.pad(w_t, ((0, Kp - self.input_dim),
                                    (0, Np - self.output_dim)))
            self._prepared[key] = jax.block_until_ready(w_t)
        return self._prepared[key]

    def __call__(self, x):
        M, K = x.shape
        assert K == self.input_dim, f"expected (*, {self.input_dim}), got {x.shape}"
        cdt = self.compute_dtype
        in_isz = jnp.dtype(cdt if cdt is not None else x.dtype).itemsize
        out_isz = jnp.dtype(x.dtype).itemsize
        use_scratch = jnp.dtype(x.dtype) != jnp.dtype(jnp.float32)

        plan = _plan(M, K, self.output_dim, in_isz, out_isz, use_scratch)
        w_t = self._prepare_weight(plan)
        return _dense_forward(
            x, w_t, self._bias,
            tm=plan["tm"], tn=plan["tn"], tk=plan["tk"],
            w_buffers=plan["w_buffers"], vmem_limit=plan["vmem_limit"],
            compute_dtype=cdt,
        )


if __name__ == "__main__":
    # Small shapes consistent with DenseLayer(input_dim, output_dim).
    batch, input_dim, output_dim = 8, 32, 64

    key = jax.random.PRNGKey(0)
    kx, kw, kb = jax.random.split(key, 3)

    # Deterministic init mimicking nn.Linear: U(-1/sqrt(in), 1/sqrt(in)).
    bound = 1.0 / math.sqrt(input_dim)
    w = jax.random.uniform(kw, (output_dim, input_dim), jnp.float32,
                           minval=-bound, maxval=bound)   # PyTorch layout (N, K)
    b = jax.random.uniform(kb, (output_dim,), jnp.float32,
                           minval=-bound, maxval=bound)
    x = jax.random.normal(kx, (batch, input_dim), jnp.float32)

    # f32 compute so the strict reference check passes; use
    # compute_dtype=jnp.bfloat16 at production sizes on v6e/v7x for MXU rate.
    layer = DenseLayerPallas(w, b)
    out = jax.block_until_ready(layer(x))

    # Reference check against plain JAX (same math as nn.Linear forward).
    ref = x @ w.T + b
    assert out.shape == (batch, output_dim)
    assert jnp.allclose(out, ref, atol=1e-5, rtol=1e-5)

    print("KERNEL_OK")
</pallas_src>

<mosaic_0001>
module attributes {stable_mosaic.version = 11 : i64} {
  func.func @_dense_kernel_f32_out(%arg0: i32, %arg1: i32, %arg2: i32, %arg3: memref<8x128xf32, #tpu.memory_space<vmem>>, %arg4: memref<128x128xf32, #tpu.memory_space<vmem>>, %arg5: memref<1x128xf32, #tpu.memory_space<vmem>>, %arg6: memref<8x128xf32, #tpu.memory_space<vmem>>) attributes {dimension_semantics = [#tpu.dimension_semantics<parallel>, #tpu.dimension_semantics<parallel>, #tpu.dimension_semantics<arbitrary>], iteration_bounds = array<i64: 1, 1, 1>, scalar_prefetch = 0 : i64, scratch_operands = 0 : i64, tpu.core_type = #tpu.core_type<tc>, window_params = [{transform_indices = @transform_0, window_bounds = array<i64: 8, 128>}, {transform_indices = @transform_1, window_bounds = array<i64: 128, 128>}, {transform_indices = @transform_2, window_bounds = array<i64: 1, 128>}, {transform_indices = @transform_3, window_bounds = array<i64: 8, 128>}]} {
    %c0_i32 = arith.constant 0 : i32
    %0 = arith.cmpi eq, %arg2, %c0_i32 : i32
    %1 = arith.extui %0 : i1 to i32
    %c0_i32_0 = arith.constant 0 : i32
    %2 = arith.cmpi ne, %1, %c0_i32_0 : i32
    scf.if %2 {
      %cst_8 = arith.constant 0.000000e+00 : f32
      %9 = vector.broadcast %cst_8 : f32 to vector<8x128xf32>
      %c0_9 = arith.constant 0 : index
      %c0_10 = arith.constant 0 : index
      %10 = vector.load %arg5[%c0_9, %c0_10] : memref<1x128xf32, #tpu.memory_space<vmem>>, vector<1x128xf32>
      %11 = vector.broadcast %10 : vector<1x128xf32> to vector<8x128xf32>
      %12 = arith.addf %9, %11 : vector<8x128xf32>
      %c0_11 = arith.constant 0 : index
      %c0_12 = arith.constant 0 : index
      %13 = vector.load %arg6[%c0_11, %c0_12] : memref<8x128xf32, #tpu.memory_space<vmem>>, vector<8x128xf32>
      tpu.vector_store %arg6[%c0_11, %c0_12], %12 {strides = array<i32>} : memref<8x128xf32, #tpu.memory_space<vmem>>, vector<8x128xf32>,
    } else {
    }
    %c0 = arith.constant 0 : index
    %c0_1 = arith.constant 0 : index
    %3 = vector.load %arg6[%c0, %c0_1] : memref<8x128xf32, #tpu.memory_space<vmem>>, vector<8x128xf32>
    %c0_2 = arith.constant 0 : index
    %c0_3 = arith.constant 0 : index
    %4 = vector.load %arg3[%c0_2, %c0_3] : memref<8x128xf32, #tpu.memory_space<vmem>>, vector<8x128xf32>
    %c0_4 = arith.constant 0 : index
    %c0_5 = arith.constant 0 : index
    %5 = vector.load %arg4[%c0_4, %c0_5] : memref<128x128xf32, #tpu.memory_space<vmem>>, vector<128x128xf32>
    %cst = arith.constant dense<0.000000e+00> : vector<8x128xf32>
    %6 = tpu.matmul %4, %5, %cst {dimension_numbers = #tpu.dot_dimension_numbers<[1], [0], [0], [1], [0, 0, 1, 1], [], []>} : vector<8x128xf32>, vector<128x128xf32>, vector<8x128xf32> -> vector<8x128xf32>
    %7 = arith.addf %3, %6 : vector<8x128xf32>
    %c0_6 = arith.constant 0 : index
    %c0_7 = arith.constant 0 : index
    %8 = vector.load %arg6[%c0_6, %c0_7] : memref<8x128xf32, #tpu.memory_space<vmem>>, vector<8x128xf32>
    tpu.vector_store %arg6[%c0_6, %c0_7], %7 {strides = array<i32>} : memref<8x128xf32, #tpu.memory_space<vmem>>, vector<8x128xf32>,
    return
  }
  func.func @transform_0(%arg0: i32, %arg1: i32, %arg2: i32) -> (i32, i32) {
    %c0_i32 = arith.constant 0 : i32
    return %arg0, %arg2 : i32, i32
  }
  func.func @transform_1(%arg0: i32, %arg1: i32, %arg2: i32) -> (i32, i32) {
    %c0_i32 = arith.constant 0 : i32
    return %arg2, %arg1 : i32, i32
  }
  func.func @transform_2(%arg0: i32, %arg1: i32, %arg2: i32) -> (i32, i32) {
    %c0_i32 = arith.constant 0 : i32
    %c0_i32_0 = arith.constant 0 : i32
    return %c0_i32, %arg1 : i32, i32
  }
  func.func @transform_3(%arg0: i32, %arg1: i32, %arg2: i32) -> (i32, i32) {
    %c0_i32 = arith.constant 0 : i32
    return %arg0, %arg1 : i32, i32
  }
}

</mosaic_0001>

<bundles_post_ra>
// kernel: _dense_forward.1
= control target key start
LH: loop header
LB: loop body
LE: loop exit
PB: predicated region body
PF: predicated region fallthrough
CT: control target
= control target key end

     0   :  { %8 = vsyncpa [#allocation3], 0  ;;  %s191_s0 = inlined_call_operand.vmem [shape: f32[8,128], index: 0, kind: input, shape index: {}]   ;;  %s192_s1 = inlined_call_operand.hbm [shape: f32[128,128], index: 1, kind: input, shape index: {}]   ;;  %s193_s2 = inlined_call_operand.vmem [shape: f32[1,128], index: 2, kind: input, shape index: {}]   ;;  %s194_s3 = inlined_call_operand.hbm [shape: f32[8,128], index: 3, kind: output, shape index: {}]  }
   0x1   :  { %9 = vsyncpa [#allocation4], 0  ;;  %s16_s14 = sshll.u32 %s192_s1, 4  ;;  %s155_s15 = smov [#allocation2]   ;;  %s17_s14 = int_to_ptr.hbm [resolvable:$true] %s16_s14 }
   0x2   :  { %s18_s16 = sshll.u32 %s155_s15, 4  ;;  %s156_s17 = smov 128   ;;  %s19_s16 = int_to_ptr.vmem [resolvable:$true] %s18_s16 }
   0x3   :  { %s157_s18 = smov 8  }
   0x4   :  { %24 = dma.hbm_to_vmem [thread:$0]  %s17_s14, 2048, %s19_s16, [#allocation3], %s156_s17, %s156_s17, %s157_s18  }
   0x5   :  { %151 = dma.done.wait [#allocation3], 2048  }
   0x6   :  { %152 = vsyncadd [#allocation3], 4294965248  ;;  %v58_v0 = vld [vmem:[#allocation2 + $0x78] sm:$0xff]  ;;  %v57_v1 = vld [vmem:[#allocation2 + $0x70] sm:$0xff]  ;;  %s158_s22 = smov [#allocation5]   ;;  %s88_s26 = sshll.u32 %s194_s3, 4  ;;  %s89_s26 = int_to_ptr.hbm [resolvable:$true] %s88_s26 }
   0x7   :  { %59 = vmatpush.msra.mxu0 %v58_v0  ;;  %v56_v2 = vld [vmem:[#allocation2 + $0x68] sm:$0xff]  ;;  %v55_v3 = vld [vmem:[#allocation2 + $0x60] sm:$0xff]  ;;  %v54_v4 = vld [vmem:[#allocation2 + $0x58] sm:$0xff]  ;;  %s86_s23 = sshll.u32 %s158_s22, 4  ;;  %s87_s23 = int_to_ptr.vmem [resolvable:$true] %s86_s23 }
   0x8   :  { %v53_v5 = vld [vmem:[#allocation2 + $0x50] sm:$0xff]  ;;  %v52_v6 = vld [vmem:[#allocation2 + $0x48] sm:$0xff]  ;;  %v51_v7 = vld [vmem:[#allocation2 + $0x40] sm:$0xff] }
   0x9   :  { %60 = vmatpush.msra.mxu0 %v57_v1  ;;  %v50_v8 = vld [vmem:[#allocation2 + $0x38] sm:$0xff]  ;;  %v49_v9 = vld [vmem:[#allocation2 + $0x30] sm:$0xff]  ;;  %v48_v10 = vld [vmem:[#allocation2 + $0x28] sm:$0xff] }
   0xa   :  { %v47_v11 = vld [vmem:[#allocation2 + $0x20] sm:$0xff]  ;;  %v46_v12 = vld [vmem:[#allocation2 + $0x18] sm:$0xff]  ;;  %v45_v13 = vld [vmem:[#allocation2 + $0x10] sm:$0xff] }
   0xb   :  { %61 = vmatpush.msra.mxu0 %v56_v2  ;;  %v44_v14 = vld [vmem:[#allocation2 + $0x8] sm:$0xff]  ;;  %v43_v15 = vld [vmem:[#allocation2] sm:$0xff] }
   0xc   :  { %v42_v16 = vld [vmem:[%s191_s0] sm:$0xff] }
   0xd   :  { %62 = vmatpush.msra.mxu0 %v55_v3  ;;  %v102_v17 = vld [vmem:[%s193_s2] ss:$0 sm:$0xff] }
   0xf   :  { %63 = vmatpush.msra.mxu0 %v54_v4 }
  0x11   :  { %64 = vmatpush.msra.mxu0 %v53_v5 }
  0x13   :  { %65 = vmatpush.msra.mxu0 %v52_v6 }
  0x15   :  { %66 = vmatpush.msra.mxu0 %v51_v7 }
  0x17   :  { %67 = vmatpush.msra.mxu0 %v50_v8 }
  0x19   :  { %68 = vmatpush.msra.mxu0 %v49_v9 }
  0x1b   :  { %69 = vmatpush.msra.mxu0 %v48_v10 }
  0x1d   :  { %70 = vmatpush.msra.mxu0 %v47_v11 }
  0x1f   :  { %71 = vmatpush.msra.mxu0 %v46_v12 }
  0x21   :  { %72 = vmatpush.msra.mxu0 %v45_v13 }
  0x23   :  { %73 = vmatpush.msra.mxu0 %v44_v14 }
  0x25   :  { %74 = vmatpush.msra.mxu0 %v43_v15 }
  0x26   :  { %75 = vmatmul.f32.vlgmr.msra.gmra.mxu0 %v42_v16 }
  0xa3   :  { %v76_v18 = vpop.f32.mrf.mxu0 }
  0xa4   :  { %v79_v19 = vadd.f32 %v102_v17, %v76_v18 }
  0xa6   :  { %80 = vst [vmem:[#allocation5] sm:$0xff] %v79_v19 }
  0xa7   :  { %91 = dma.vmem_to_hbm [thread:$0]  %s87_s23, 128, %s89_s26, [#allocation4]  }
  0xa8   :  { %153 = dma.done.wait [#allocation4], 128  }
  0xa9   :  { %154 = vsyncadd [#allocation4], 4294967168 }
  0xaa   :  { %96 = vsyncpa [#allocation3], 1 }
  0xab   :  { %97 = vsyncpa [#allocation4], 1 }

</bundles_post_ra>
